<compile_context>
chip_gen: v5e
topology: v5e:2x2
jax: 0.10.0
libtpu: 0.0.40
codegen_flags: <defaults>
</compile_context>

<pallas_src>
import functools

import jax
import jax.numpy as jnp
from jax.experimental import pallas as pl
from jax.experimental.pallas import tpu as pltpu


_BYTE_TARGET = 8 << 20        # target HBM bytes moved per grid step
_MAX_BATCH_BLOCK = 32         # cap on the in-kernel unrolled per-image loop


def _outconv_kernel(x_ref, w_ref, b_ref, o_ref):
    # x_ref: (Bn, Cin, TS)   w_ref: (Cout, Cin)   b_ref: (Cout, 1)   o_ref: (Bn, Cout, TS)
    w = w_ref[...]
    b = b_ref[...]
    for i in range(x_ref.shape[0]):          # Bn is static and small: unrolled
        acc = jnp.dot(w, x_ref[i], preferred_element_type=jnp.float32)
        o_ref[i] = (acc + b).astype(o_ref.dtype)


@functools.lru_cache(maxsize=1)
def _vmem_budget_bytes():
    """Per-generation VMEM working-set budget (leaves compiler headroom)."""
    cap = 64 << 20                            # conservative default: v7x TC VMEM
    try:
        info = pltpu.get_tpu_info()
        c = getattr(info, "vmem_capacity_bytes", None)
        if c:
            cap = int(c)
    except Exception:
        pass
    return (cap * 3) // 4


def _plan_tiles(N, Cin, Cout, HW, itemsize):
    """Pick (Bn, ts): images per step and pixels per step (lane axis)."""
    per_px = (Cin + Cout) * itemsize          # HBM bytes per output pixel
    budget = _vmem_budget_bytes()
    step_bytes = max(per_px, min(_BYTE_TARGET, budget // 2))  # double-buffered

    if N > 1 and HW * per_px < step_bytes:
        # Small images: pack several whole images into one contiguous DMA.
        ts = HW
        Bn = min(N, _MAX_BATCH_BLOCK, max(1, step_bytes // (HW * per_px)))
    else:
        # Large images: tile the pixel (lane) axis from the byte budget.
        Bn = 1
        ts = max(128, (step_bytes // per_px) // 128 * 128)
        if ts >= HW:
            ts = HW

    # Keep >= 2 grid steps when splittable (v7x has 2 TensorCores).
    steps = pl.cdiv(N, Bn) * pl.cdiv(HW, ts)
    if steps < 2:
        if Bn >= 2:
            Bn = (Bn + 1) // 2
        elif ts > 128:
            ts = max(128, pl.cdiv(pl.cdiv(HW, 2), 128) * 128)
    return Bn, ts


@jax.jit
def outconv_forward(x_nchw, weight, bias):
    """1x1 Conv2d forward (NCHW), matching nn.Conv2d(in, out, kernel_size=1).

    x_nchw: (N, Cin, H, W)   weight: (Cout, Cin, 1, 1)   bias: (Cout,)
    returns (N, Cout, H, W)
    """
    N, Cin, H, W = x_nchw.shape
    Cout = weight.shape[0]
    HW = H * W
    itemsize = jnp.dtype(x_nchw.dtype).itemsize

    Bn, ts = _plan_tiles(N, Cin, Cout, HW, itemsize)

    # Free reshapes: NCHW is already channel-major / pixel-minor.
    x3d = x_nchw.reshape(N, Cin, HW)
    w2d = weight.reshape(Cout, Cin).astype(x_nchw.dtype)   # MXU dtype match
    b2d = bias.reshape(Cout, 1).astype(jnp.float32)        # added to f32 acc

    grid = (pl.cdiv(N, Bn), pl.cdiv(HW, ts))

    cost = pl.CostEstimate(
        flops=2 * N * HW * Cin * Cout,
        transcendentals=0,
        bytes_accessed=N * HW * (Cin + Cout) * itemsize
        + Cout * Cin * itemsize + Cout * 4,
    )

    # Double-buffered input/output tiles + resident weight/bias + headroom.
    work = (2 * Bn * ts * (Cin + Cout) * itemsize
            + 4 * (Cout * Cin * itemsize + Cout * 4))
    vmem_limit = int(max(work + (2 << 20), 4 << 20))

    out3d = pl.pallas_call(
        _outconv_kernel,
        out_shape=jax.ShapeDtypeStruct((N, Cout, HW), x_nchw.dtype),
        grid=grid,
        in_specs=[
            pl.BlockSpec((Bn, Cin, ts), lambda n, t: (n, 0, t)),  # pixels on lanes
            pl.BlockSpec((Cout, Cin), lambda n, t: (0, 0)),       # resident weight
            pl.BlockSpec((Cout, 1), lambda n, t: (0, 0)),         # resident bias
        ],
        out_specs=pl.BlockSpec((Bn, Cout, ts), lambda n, t: (n, 0, t)),
        compiler_params=pltpu.CompilerParams(
            dimension_semantics=("parallel", "parallel"),
            vmem_limit_bytes=vmem_limit,
        ),
        cost_estimate=cost,
    )(x3d, w2d, b2d)

    return out3d.reshape(N, Cout, H, W)


if __name__ == "__main__":
    key = jax.random.PRNGKey(0)
    kx, kw, kb = jax.random.split(key, 3)

    N, Cin, Cout, H, W = 2, 4, 3, 16, 16
    x = jax.random.normal(kx, (N, Cin, H, W), dtype=jnp.float32)
    # Deterministic synthetic parameters (PyTorch-like uniform init range).
    bound = 1.0 / (Cin ** 0.5)
    weight = jax.random.uniform(kw, (Cout, Cin, 1, 1), jnp.float32, -bound, bound)
    bias = jax.random.uniform(kb, (Cout,), jnp.float32, -bound, bound)

    out = outconv_forward(x, weight, bias)
    jax.block_until_ready(out)

    # Reference check in plain JAX (same math as nn.Conv2d kernel_size=1).
    ref = (jnp.einsum("nchw,oc->nohw", x, weight.reshape(Cout, Cin))
           + bias[None, :, None, None])
    assert out.shape == (N, Cout, H, W)
    assert jnp.allclose(out, ref, atol=1e-5, rtol=1e-5)

    print("KERNEL_OK")
</pallas_src>

<mosaic_0001>
module attributes {stable_mosaic.version = 11 : i64} {
  func.func @_outconv_kernel(%arg0: i32, %arg1: i32, %arg2: memref<1x4x256xf32, #tpu.memory_space<vmem>>, %arg3: memref<3x4xf32, #tpu.memory_space<vmem>>, %arg4: memref<3x1xf32, #tpu.memory_space<vmem>>, %arg5: memref<1x3x256xf32, #tpu.memory_space<vmem>>) attributes {dimension_semantics = [#tpu.dimension_semantics<parallel>, #tpu.dimension_semantics<parallel>], iteration_bounds = array<i64: 2, 1>, scalar_prefetch = 0 : i64, scratch_operands = 0 : i64, tpu.core_type = #tpu.core_type<tc>, window_params = [{transform_indices = @transform_0, window_bounds = array<i64: 1, 4, 256>}, {pipeline_mode = #tpu.pipeline_mode<synchronous>, transform_indices = @transform_1, window_bounds = array<i64: 3, 4>}, {pipeline_mode = #tpu.pipeline_mode<synchronous>, transform_indices = @transform_2, window_bounds = array<i64: 3, 1>}, {transform_indices = @transform_3, window_bounds = array<i64: 1, 3, 256>}]} {
    %c0 = arith.constant 0 : index
    %c0_0 = arith.constant 0 : index
    %0 = vector.load %arg3[%c0, %c0_0] : memref<3x4xf32, #tpu.memory_space<vmem>>, vector<3x4xf32>
    %c0_1 = arith.constant 0 : index
    %c0_2 = arith.constant 0 : index
    %1 = vector.load %arg4[%c0_1, %c0_2] : memref<3x1xf32, #tpu.memory_space<vmem>>, vector<3x1xf32>
    %c0_3 = arith.constant 0 : index
    %c0_4 = arith.constant 0 : index
    %c0_5 = arith.constant 0 : index
    %2 = vector.load %arg2[%c0_3, %c0_4, %c0_5] : memref<1x4x256xf32, #tpu.memory_space<vmem>>, vector<1x4x256xf32>
    %3 = vector.shape_cast %2 : vector<1x4x256xf32> to vector<4x256xf32>
    %cst = arith.constant dense<0.000000e+00> : vector<3x256xf32>
    %4 = tpu.matmul %0, %3, %cst {dimension_numbers = #tpu.dot_dimension_numbers<[1], [0], [0], [1], [0, 0, 1, 1], [], []>} : vector<3x4xf32>, vector<4x256xf32>, vector<3x256xf32> -> vector<3x256xf32>
    %5 = vector.broadcast %1 : vector<3x1xf32> to vector<3x256xf32>
    %6 = arith.addf %4, %5 : vector<3x256xf32>
    %c0_6 = arith.constant 0 : index
    %c0_7 = arith.constant 0 : index
    %c0_8 = arith.constant 0 : index
    %7 = vector.load %arg5[%c0_6, %c0_7, %c0_8] : memref<1x3x256xf32, #tpu.memory_space<vmem>>, vector<1x3x256xf32>
    %8 = vector.shape_cast %7 : vector<1x3x256xf32> to vector<3x256xf32>
    %9 = vector.shape_cast %6 : vector<3x256xf32> to vector<1x3x256xf32>
    tpu.vector_store %arg5[%c0_6, %c0_7, %c0_8], %9 {strides = array<i32>} : memref<1x3x256xf32, #tpu.memory_space<vmem>>, vector<1x3x256xf32>,
    return
  }
  func.func @transform_0(%arg0: i32, %arg1: i32) -> (i32, i32, i32) {
    %c0_i32 = arith.constant 0 : i32
    %c0_i32_0 = arith.constant 0 : i32
    return %arg0, %c0_i32, %arg1 : i32, i32, i32
  }
  func.func @transform_1(%arg0: i32, %arg1: i32) -> (i32, i32) {
    %c0_i32 = arith.constant 0 : i32
    %c0_i32_0 = arith.constant 0 : i32
    %c0_i32_1 = arith.constant 0 : i32
    return %c0_i32, %c0_i32_0 : i32, i32
  }
  func.func @transform_2(%arg0: i32, %arg1: i32) -> (i32, i32) {
    %c0_i32 = arith.constant 0 : i32
    %c0_i32_0 = arith.constant 0 : i32
    %c0_i32_1 = arith.constant 0 : i32
    return %c0_i32, %c0_i32_0 : i32, i32
  }
  func.func @transform_3(%arg0: i32, %arg1: i32) -> (i32, i32, i32) {
    %c0_i32 = arith.constant 0 : i32
    %c0_i32_0 = arith.constant 0 : i32
    return %arg0, %c0_i32, %arg1 : i32, i32, i32
  }
}

</mosaic_0001>

<bundles_post_ra>
// kernel: outconv_forward.1
= control target key start
LH: loop header
LB: loop body
LE: loop exit
PB: predicated region body
PF: predicated region fallthrough
CT: control target
= control target key end

     0   :  { %s452_s12 = smov 0   ;;  %s454_s13 = smov 0   ;;  %s494_s0 = inlined_call_operand.vmem [shape: f32[2,4,256], index: 0, kind: input, shape index: {}]   ;;  %s495_s1 = inlined_call_operand.vmem [shape: f32[3,4], index: 1, kind: input, shape index: {}]   ;;  %s496_s2 = inlined_call_operand.vmem [shape: f32[3,1], index: 2, kind: input, shape index: {}]   ;;  %s497_s3 = inlined_call_operand.vmem [shape: f32[2,3,256], index: 3, kind: output, shape index: {}]  }
   0x1   :  { %s456_s14 = smov 0  }
   0x2 LB: > { %s25_s15 = sadd.s32 1, %s425_s13  ;;  %p368_p0 = scmp.ge.s32.totalorder %s429_s14, 1  ;;  %s429_s14 = sphi %s456_s14, %s13_s14   ;;  %s425_s13 = sphi %s454_s13, %s499_s13   ;;  %s421_s12 = sphi %s452_s12, %s498_s12  }
   0x3   : > { %p27_p1 = scmp.ge.s32.totalorder %s25_s15, 2  ;;  %p158_p2 = scmp.lt.s32.totalorder %s429_s14, 3 }
   0x5   : > { %s501_s15 = smov (%p27_p1, %s25_s15), 0  ;;  %p159_p3 = pnand %p368_p0, %p158_p2 }
   0x6   : > { %p191_p4 = scmp.lt.s32.totalorder (!%p159_p3), %s421_s12, 1 }
   0x7   : > { %162 = sbr.rel (%p159_p3) target bundleno = 157 (0x9d), region = 32 }
   0xc   : > { %v431_v0 = vmov 0   ;;  %v211_v1 = vld [vmem:[%s496_s2] sm:$0x7]  ;;  %s503_s12 = smov (!%p191_p4, %s421_s12), 1  ;;  %vm226_vm0 = vcmask 1043456   ;;  %vm222_vm1 = vcmask 31744  }
   0xd   : > { %406 = vset.pattern.permute.xlu0 %v431_v0  ;;  %s379_s18 = sshll.u32 %s503_s12, 3  ;;  %v210_v3 = vld [vmem:[%s495_s1] sm:$0x7] }
   0xe   : > { %215 = vperm.xlu0 %406, %v211_v1   ;;  %s198_s21 = scalar_lea.vmem %s494_s0, %s379_s18  ;;  %s208_s26 = scalar_lea.vmem %s497_s3, %s379_s18 }
   0xf   : > { %v212_v2 = vld [vmem:[%s198_s21] sm:$0xff] }
  0x10   : > { %219 = vst [vmem:[#allocation1] ss:$2 sm:$0xff] %v212_v2 }
  0x17   : > { %v220_v4 = vld.sshfl [vmem:[#allocation1] sm:$0xff pattern:$0x75316420]  ;;  %v221_v5 = vld.sshfl [vmem:[#allocation1 + $0x8] sm:$0xff pattern:$0x75316420] }
  0x18   : > { %373 = vmatpush.msk.msra.mxu0 %vm226_vm0, %v220_v4  ;;  %375 = vmatpush.msk.msra.mxu1 %vm226_vm0, %v221_v5 }
  0x19   : > { %374 = vmatmul.msk.f32.vlgmr.msra.gmra.mxu0 %vm222_vm1, %v210_v3  ;;  %376 = vmatmul.msk.f32.vlgmr.msra.gmra.mxu1 %vm222_vm1, %v210_v3 }
  0x80   : > { %v216_v6 = vpop.permute.xlu0 %215 }
  0x96   : > { %v248_v7 = vpop.f32.mrf.mxu0  ;;  %v268_v8 = vpop.f32.mrf.mxu1 }
  0x97   : > { %v269_v9 = vadd.f32 %v268_v8, %v216_v6  ;;  %v249_v10 = vadd.f32 %v248_v7, %v216_v6 }
  0x99   : > { %v273_v11 = vrot.slane %v269_v9, 4 }
  0x9b   : > { %v274_v12 = vsel %vm226_vm0, %v249_v10, %v273_v11 }
  0x9c   : > { %276 = vst [vmem:[%s208_s26] sm:$0x77] %v274_v12 }
  0x9d PF: > { %s13_s14 = sadd.s32 1, %s429_s14   ;;  %s498_s12 = smov %s425_s13 }
  0x9e   : > { %p10_p5 = scmp.ge.s32.totalorder %s13_s14, 4   ;;  %s499_s13 = smov %s501_s15 }
  0xa0   :  { %12 = sbr.rel (!%p10_p5) target bundleno = 2 (0x2), region = 62 }

</bundles_post_ra>
